<compile_context>
chip_gen: v5e
topology: v5e:2x2
jax: 0.10.0
libtpu: 0.0.40
codegen_flags: <defaults>
</compile_context>

<pallas_src>
import functools

import jax
import jax.numpy as jnp
from jax.experimental import pallas as pl
from jax.experimental.pallas import tpu as pltpu

NUM_SUPPORTS = 51
ACTION_COUNT = 4
OBS_SHAPE = (8,)            # flat_obs_dim = 8
HIDDEN = 64
BATCH = 2

S_PAD = 128                 # supports padded to one full vreg lane width
NEG_BIG = -1e30             # pad-lane bias -> exp() underflows to exactly 0
PARAM_DTYPE = jnp.bfloat16  # MXU-native; halves weight DMA


def _round_up(n, m):
    return (n + m - 1) // m * m


# -----------------------------------------------------------------------------
# Kernel
# -----------------------------------------------------------------------------
def _qnet_kernel(x_ref, ps_ref, pw_ref, out_ref, *, d_in, hidden, action_count,
                 s_pad, off_b1, off_w2, off_b2, off_b3, compute_dtype):
    """One batch tile: 3 bf16 matmuls (f32 acc) + ReLU + per-action softmax."""
    f32 = jnp.float32
    x = x_ref[...].astype(compute_dtype)

    # Layer 1: Linear(d_in, hidden) + ReLU
    w1 = ps_ref[0:d_in, 0:hidden]
    b1 = ps_ref[off_b1:off_b1 + 1, 0:hidden].astype(f32)
    h1 = jnp.maximum(jnp.dot(x, w1, preferred_element_type=f32) + b1, 0.0)

    # Layer 2: Linear(hidden, hidden) + ReLU
    w2 = ps_ref[off_w2:off_w2 + hidden, 0:hidden]
    b2 = ps_ref[off_b2:off_b2 + 1, 0:hidden].astype(f32)
    h2 = jnp.maximum(
        jnp.dot(h1.astype(compute_dtype), w2, preferred_element_type=f32) + b2,
        0.0)

    # Layer 3: Linear(hidden, A * S_PAD); pad lanes carry 0-weights & -1e30 bias.
    w3 = pw_ref[0:hidden, :]
    b3 = pw_ref[off_b3:off_b3 + 1, :].astype(f32)
    logits = jnp.dot(h2.astype(compute_dtype), w3,
                     preferred_element_type=f32) + b3

    # Per-action softmax on 128-lane-aligned segments; pad lanes exp to 0 so the
    # denominator equals the true 51-support sum.  Each segment is stored
    # directly (no concatenate temporary) as a full 128-lane unmasked vst.
    for a in range(action_count):
        seg = logits[:, a * s_pad:(a + 1) * s_pad]
        m = jnp.max(seg, axis=-1, keepdims=True)
        e = jnp.exp(seg - m)
        denom = jnp.sum(e, axis=-1, keepdims=True)
        # Exact reciprocal on a (tb, 1) column: essentially free and keeps each
        # action's probabilities summing to 1 to f32 precision.
        out_ref[:, a * s_pad:(a + 1) * s_pad] = (
            e * (1.0 / denom)).astype(out_ref.dtype)


# -----------------------------------------------------------------------------
# Parameter packing (call ONCE when weights change, not per forward).
# -----------------------------------------------------------------------------
def pack_params(params, *, d_in, hidden, action_count, num_supports, s_pad,
                param_dtype=PARAM_DTYPE):
    """Packs the 6 parameter tensors into two tight bf16 buffers.

    Returns (small, wide, offs):
      small: (rows_s, 128)  -- W1, b1, W2, b2 in lanes 0:hidden
      wide : (rows_w, A*s_pad) -- W3 (rows 0:hidden) and b3 (row `hidden`), with
             each action's 51 real supports scattered into its 128-lane segment;
             pad lanes get zero weights and a -1e30 bias so exp() -> 0.
    """
    w1, b1, w2, b2, w3, b3 = params
    w_out = action_count * s_pad

    off_w1 = 0
    off_b1 = _round_up(d_in, 8)
    off_w2 = off_b1 + 8
    off_b2 = off_w2 + hidden
    rows_s = _round_up(off_b2 + 1, 8)

    small = jnp.zeros((rows_s, 128), jnp.float32)
    small = small.at[off_w1:off_w1 + d_in, 0:hidden].set(w1)
    small = small.at[off_b1, 0:hidden].set(b1.reshape(-1))
    small = small.at[off_w2:off_w2 + hidden, 0:hidden].set(w2)
    small = small.at[off_b2, 0:hidden].set(b2.reshape(-1))

    off_w3 = 0
    off_b3 = hidden
    rows_w = _round_up(off_b3 + 1, 8)
    wide = jnp.zeros((rows_w, w_out), jnp.float32)
    b3_flat = b3.reshape(-1)
    b3_row = jnp.full((w_out,), NEG_BIG, jnp.float32)
    for a in range(action_count):
        wide = wide.at[off_w3:off_w3 + hidden,
                       a * s_pad:a * s_pad + num_supports].set(
                           w3[:, a * num_supports:(a + 1) * num_supports])
        b3_row = b3_row.at[a * s_pad:a * s_pad + num_supports].set(
            b3_flat[a * num_supports:(a + 1) * num_supports])
    wide = wide.at[off_b3, :].set(b3_row)

    offs = dict(off_b1=off_b1, off_w2=off_w2, off_b2=off_b2, off_b3=off_b3)
    return small.astype(param_dtype), wide.astype(param_dtype), offs


# -----------------------------------------------------------------------------
# Wrapper
# -----------------------------------------------------------------------------
def qnet_forward(x, packed, *, action_count, num_supports, block_batch=512,
                 out_dtype=jnp.float32):
    small, wide, offs = packed
    batch, d_in = x.shape
    hidden = HIDDEN
    s_pad = S_PAD
    w_out = action_count * s_pad

    # Batch tiling: multiple of 8 sublanes, up to block_batch rows per grid step.
    bp = _round_up(batch, 8)
    tb = min(block_batch, bp)
    # Prefer >=2 grid steps when the batch allows it so ("parallel",) can shard
    # the batch across v7x's 2 TensorCores.
    if bp > 8 and bp == tb:
        tb = _round_up(bp // 2, 8)
    bp = _round_up(bp, tb)
    if bp != batch:
        x = jnp.pad(x, ((0, bp - batch), (0, 0)))
    grid = (bp // tb,)

    kernel = functools.partial(
        _qnet_kernel, d_in=d_in, hidden=hidden, action_count=action_count,
        s_pad=s_pad, compute_dtype=small.dtype, **offs)

    flops = 2 * bp * (d_in * hidden + hidden * hidden + hidden * w_out)
    cost = pl.CostEstimate(
        flops=flops,
        transcendentals=bp * w_out,
        bytes_accessed=(4 * bp * d_in + 2 * (small.size + wide.size)
                        + jnp.dtype(out_dtype).itemsize * bp * w_out))

    out2d = pl.pallas_call(
        kernel,
        out_shape=jax.ShapeDtypeStruct((bp, w_out), out_dtype),
        grid_spec=pltpu.PrefetchScalarGridSpec(
            num_scalar_prefetch=0,
            grid=grid,
            in_specs=[
                pl.BlockSpec((tb, d_in), lambda i: (i, 0)),     # batch tile
                pl.BlockSpec(small.shape, lambda i: (0, 0)),    # weights resident
                pl.BlockSpec(wide.shape, lambda i: (0, 0)),     # weights resident
            ],
            out_specs=pl.BlockSpec((tb, w_out), lambda i: (i, 0)),
        ),
        compiler_params=pltpu.CompilerParams(
            dimension_semantics=("parallel",)),   # shards batch over v7x's 2 TCs
        cost_estimate=cost,
    )(x, small, wide)

    # Lane-dense 2-D kernel output -> (B, A, S) in plain JAX.  Pad lanes are
    # exactly 0, so downstream consumers may instead keep the padded (bp, A*128)
    # layout to avoid this extra HBM round trip at large batch.
    out = out2d[:batch].reshape(batch, action_count, s_pad)[:, :, :num_supports]
    return out


# -----------------------------------------------------------------------------
# Init + reference
# -----------------------------------------------------------------------------
def _orthogonal(key, shape, dtype=jnp.float32):
    """Deterministic orthogonal init (mimics init_orthogonal / nn.init.orthogonal_)."""
    n_in, n_out = shape
    a = jax.random.normal(key, (max(n_in, n_out), min(n_in, n_out)), dtype)
    q, r = jnp.linalg.qr(a)
    q = q * jnp.sign(jnp.diag(r))
    if n_in < n_out:
        q = q.T
    return q[:n_in, :n_out].astype(dtype)


def init_qnet_params(key, flat_obs_dim, action_count, num_supports):
    k1, k2, k3, k4, k5, k6 = jax.random.split(key, 6)
    w1 = _orthogonal(k1, (flat_obs_dim, HIDDEN))
    b1 = 0.1 * jax.random.normal(k4, (1, HIDDEN), jnp.float32)
    w2 = _orthogonal(k2, (HIDDEN, HIDDEN))
    b2 = 0.1 * jax.random.normal(k5, (1, HIDDEN), jnp.float32)
    w3 = _orthogonal(k3, (HIDDEN, action_count * num_supports))
    b3 = 0.1 * jax.random.normal(k6, (1, action_count * num_supports), jnp.float32)
    return (w1, b1, w2, b2, w3, b3)


def qnet_reference(x, params, *, action_count, num_supports,
                   matmul_dtype=jnp.float32):
    """Pure-JAX reference. matmul_dtype=bfloat16 mirrors the kernel arithmetic."""
    w1, b1, w2, b2, w3, b3 = params
    c = lambda a: a.astype(matmul_dtype)
    f32 = jnp.float32
    h1 = jnp.maximum(
        jnp.dot(c(x), c(w1), preferred_element_type=f32) + c(b1).astype(f32), 0.0)
    h2 = jnp.maximum(
        jnp.dot(c(h1), c(w2), preferred_element_type=f32) + c(b2).astype(f32), 0.0)
    logits = jnp.dot(c(h2), c(w3), preferred_element_type=f32) + c(b3).astype(f32)
    logits = logits.reshape(x.shape[0], action_count, num_supports)
    return jax.nn.softmax(logits, axis=-1)


if __name__ == "__main__":
    flat_obs_dim = 1
    for d in OBS_SHAPE:
        flat_obs_dim *= d

    key = jax.random.PRNGKey(0)
    kx, kp = jax.random.split(key)
    x = jax.random.normal(kx, (BATCH, flat_obs_dim), jnp.float32)
    params = init_qnet_params(kp, flat_obs_dim, ACTION_COUNT, NUM_SUPPORTS)

    # Pack weights ONCE, outside the per-call path.
    packed = pack_params(params, d_in=flat_obs_dim, hidden=HIDDEN,
                         action_count=ACTION_COUNT, num_supports=NUM_SUPPORTS,
                         s_pad=S_PAD)
    packed = jax.block_until_ready(packed)

    out = qnet_forward(x, packed, action_count=ACTION_COUNT,
                       num_supports=NUM_SUPPORTS)
    out = jax.block_until_ready(out)
    assert out.shape == (BATCH, ACTION_COUNT, NUM_SUPPORTS)

    # Tight check against a reference that mirrors the kernel's bf16 matmuls.
    ref_bf16 = qnet_reference(x, params, action_count=ACTION_COUNT,
                              num_supports=NUM_SUPPORTS,
                              matmul_dtype=jnp.bfloat16)
    assert jnp.allclose(out, ref_bf16, atol=2e-3, rtol=2e-3)

    # Loose sanity check against the pure-f32 module semantics (bf16 matmul
    # rounding only).
    ref_f32 = qnet_reference(x, params, action_count=ACTION_COUNT,
                             num_supports=NUM_SUPPORTS,
                             matmul_dtype=jnp.float32)
    assert jnp.allclose(out, ref_f32, atol=2e-2, rtol=2e-2)

    # Exact-reciprocal normalization -> per-action distributions sum to 1.
    assert jnp.allclose(jnp.sum(out, axis=-1), 1.0, atol=1e-4)

    print("KERNEL_OK")
</pallas_src>

<mosaic_0001>
module attributes {stable_mosaic.version = 11 : i64} {
  func.func @_qnet_kernel(%arg0: i32, %arg1: memref<8x8xf32, #tpu.memory_space<vmem>>, %arg2: memref<88x128xbf16, #tpu.memory_space<vmem>>, %arg3: memref<72x512xbf16, #tpu.memory_space<vmem>>, %arg4: memref<8x512xf32, #tpu.memory_space<vmem>>) attributes {dimension_semantics = [#tpu.dimension_semantics<parallel>], iteration_bounds = array<i64: 1>, scalar_prefetch = 0 : i64, scratch_operands = 0 : i64, tpu.core_type = #tpu.core_type<tc>, window_params = [{transform_indices = @transform_0, window_bounds = array<i64: 8, 8>}, {pipeline_mode = #tpu.pipeline_mode<synchronous>, transform_indices = @transform_1, window_bounds = array<i64: 88, 128>}, {pipeline_mode = #tpu.pipeline_mode<synchronous>, transform_indices = @transform_2, window_bounds = array<i64: 72, 512>}, {transform_indices = @transform_3, window_bounds = array<i64: 8, 512>}]} {
    %c0 = arith.constant 0 : index
    %c0_0 = arith.constant 0 : index
    %0 = vector.load %arg1[%c0, %c0_0] : memref<8x8xf32, #tpu.memory_space<vmem>>, vector<8x8xf32>
    %1 = arith.truncf %0 : vector<8x8xf32> to vector<8x8xbf16>
    %c0_1 = arith.constant 0 : index
    %c0_2 = arith.constant 0 : index
    %2 = vector.load %arg2[%c0_1, %c0_2] : memref<88x128xbf16, #tpu.memory_space<vmem>>, vector<8x64xbf16>
    %c8 = arith.constant 8 : index
    %c0_3 = arith.constant 0 : index
    %3 = vector.load %arg2[%c8, %c0_3] : memref<88x128xbf16, #tpu.memory_space<vmem>>, vector<1x64xbf16>
    %4 = arith.extf %3 : vector<1x64xbf16> to vector<1x64xf32>
    %cst = arith.constant dense<0.000000e+00> : vector<8x64xf32>
    %5 = tpu.matmul %1, %2, %cst {dimension_numbers = #tpu.dot_dimension_numbers<[1], [0], [0], [1], [0, 0, 1, 1], [], []>} : vector<8x8xbf16>, vector<8x64xbf16>, vector<8x64xf32> -> vector<8x64xf32>
    %6 = vector.broadcast %4 : vector<1x64xf32> to vector<8x64xf32>
    %7 = arith.addf %5, %6 : vector<8x64xf32>
    %cst_4 = arith.constant 0.000000e+00 : f32
    %8 = vector.broadcast %cst_4 : f32 to vector<8x64xf32>
    %9 = arith.maximumf %7, %8 : vector<8x64xf32>
    %c16 = arith.constant 16 : index
    %c0_5 = arith.constant 0 : index
    %10 = vector.load %arg2[%c16, %c0_5] : memref<88x128xbf16, #tpu.memory_space<vmem>>, vector<64x64xbf16>
    %c80 = arith.constant 80 : index
    %c0_6 = arith.constant 0 : index
    %11 = vector.load %arg2[%c80, %c0_6] : memref<88x128xbf16, #tpu.memory_space<vmem>>, vector<1x64xbf16>
    %12 = arith.extf %11 : vector<1x64xbf16> to vector<1x64xf32>
    %13 = arith.truncf %9 : vector<8x64xf32> to vector<8x64xbf16>
    %cst_7 = arith.constant dense<0.000000e+00> : vector<8x64xf32>
    %14 = tpu.matmul %13, %10, %cst_7 {dimension_numbers = #tpu.dot_dimension_numbers<[1], [0], [0], [1], [0, 0, 1, 1], [], []>} : vector<8x64xbf16>, vector<64x64xbf16>, vector<8x64xf32> -> vector<8x64xf32>
    %15 = vector.broadcast %12 : vector<1x64xf32> to vector<8x64xf32>
    %16 = arith.addf %14, %15 : vector<8x64xf32>
    %cst_8 = arith.constant 0.000000e+00 : f32
    %17 = vector.broadcast %cst_8 : f32 to vector<8x64xf32>
    %18 = arith.maximumf %16, %17 : vector<8x64xf32>
    %c0_9 = arith.constant 0 : index
    %c0_10 = arith.constant 0 : index
    %19 = vector.load %arg3[%c0_9, %c0_10] : memref<72x512xbf16, #tpu.memory_space<vmem>>, vector<64x512xbf16>
    %c64 = arith.constant 64 : index
    %c0_11 = arith.constant 0 : index
    %20 = vector.load %arg3[%c64, %c0_11] : memref<72x512xbf16, #tpu.memory_space<vmem>>, vector<1x512xbf16>
    %21 = arith.extf %20 : vector<1x512xbf16> to vector<1x512xf32>
    %22 = arith.truncf %18 : vector<8x64xf32> to vector<8x64xbf16>
    %cst_12 = arith.constant dense<0.000000e+00> : vector<8x512xf32>
    %23 = tpu.matmul %22, %19, %cst_12 {dimension_numbers = #tpu.dot_dimension_numbers<[1], [0], [0], [1], [0, 0, 1, 1], [], []>} : vector<8x64xbf16>, vector<64x512xbf16>, vector<8x512xf32> -> vector<8x512xf32>
    %24 = vector.broadcast %21 : vector<1x512xf32> to vector<8x512xf32>
    %25 = arith.addf %23, %24 : vector<8x512xf32>
    %26 = vector.extract_strided_slice %25 {offsets = [0, 0], sizes = [8, 128], strides = [1, 1]} : vector<8x512xf32> to vector<8x128xf32>
    %cst_13 = arith.constant dense<0xFF800000> : vector<8xf32>
    %27 = vector.multi_reduction <maximumf>, %26, %cst_13 [1] : vector<8x128xf32> to vector<8xf32>
    %28 = vector.shape_cast %27 : vector<8xf32> to vector<8x1xf32>
    %29 = vector.broadcast %28 : vector<8x1xf32> to vector<8x128xf32>
    %30 = arith.subf %26, %29 : vector<8x128xf32>
    %31 = math.exp %30 : vector<8x128xf32>
    %cst_14 = arith.constant dense<0.000000e+00> : vector<8xf32>
    %32 = vector.multi_reduction <add>, %31, %cst_14 [1] : vector<8x128xf32> to vector<8xf32>
    %33 = vector.shape_cast %32 : vector<8xf32> to vector<8x1xf32>
    %cst_15 = arith.constant 1.000000e+00 : f32
    %34 = vector.broadcast %cst_15 : f32 to vector<8x1xf32>
    %35 = arith.divf %34, %33 : vector<8x1xf32>
    %36 = vector.broadcast %35 : vector<8x1xf32> to vector<8x128xf32>
    %37 = arith.mulf %31, %36 : vector<8x128xf32>
    %c0_16 = arith.constant 0 : index
    %c0_17 = arith.constant 0 : index
    %38 = vector.load %arg4[%c0_16, %c0_17] : memref<8x512xf32, #tpu.memory_space<vmem>>, vector<8x128xf32>
    tpu.vector_store %arg4[%c0_16, %c0_17], %37 {strides = array<i32>} : memref<8x512xf32, #tpu.memory_space<vmem>>, vector<8x128xf32>,
    %39 = vector.extract_strided_slice %25 {offsets = [0, 128], sizes = [8, 128], strides = [1, 1]} : vector<8x512xf32> to vector<8x128xf32>
    %cst_18 = arith.constant dense<0xFF800000> : vector<8xf32>
    %40 = vector.multi_reduction <maximumf>, %39, %cst_18 [1] : vector<8x128xf32> to vector<8xf32>
    %41 = vector.shape_cast %40 : vector<8xf32> to vector<8x1xf32>
    %42 = vector.broadcast %41 : vector<8x1xf32> to vector<8x128xf32>
    %43 = arith.subf %39, %42 : vector<8x128xf32>
    %44 = math.exp %43 : vector<8x128xf32>
    %cst_19 = arith.constant dense<0.000000e+00> : vector<8xf32>
    %45 = vector.multi_reduction <add>, %44, %cst_19 [1] : vector<8x128xf32> to vector<8xf32>
    %46 = vector.shape_cast %45 : vector<8xf32> to vector<8x1xf32>
    %cst_20 = arith.constant 1.000000e+00 : f32
    %47 = vector.broadcast %cst_20 : f32 to vector<8x1xf32>
    %48 = arith.divf %47, %46 : vector<8x1xf32>
    %49 = vector.broadcast %48 : vector<8x1xf32> to vector<8x128xf32>
    %50 = arith.mulf %44, %49 : vector<8x128xf32>
    %c0_21 = arith.constant 0 : index
    %c128 = arith.constant 128 : index
    %51 = vector.load %arg4[%c0_21, %c128] : memref<8x512xf32, #tpu.memory_space<vmem>>, vector<8x128xf32>
    tpu.vector_store %arg4[%c0_21, %c128], %50 {strides = array<i32>} : memref<8x512xf32, #tpu.memory_space<vmem>>, vector<8x128xf32>,
    %52 = vector.extract_strided_slice %25 {offsets = [0, 256], sizes = [8, 128], strides = [1, 1]} : vector<8x512xf32> to vector<8x128xf32>
    %cst_22 = arith.constant dense<0xFF800000> : vector<8xf32>
    %53 = vector.multi_reduction <maximumf>, %52, %cst_22 [1] : vector<8x128xf32> to vector<8xf32>
    %54 = vector.shape_cast %53 : vector<8xf32> to vector<8x1xf32>
    %55 = vector.broadcast %54 : vector<8x1xf32> to vector<8x128xf32>
    %56 = arith.subf %52, %55 : vector<8x128xf32>
    %57 = math.exp %56 : vector<8x128xf32>
    %cst_23 = arith.constant dense<0.000000e+00> : vector<8xf32>
    %58 = vector.multi_reduction <add>, %57, %cst_23 [1] : vector<8x128xf32> to vector<8xf32>
    %59 = vector.shape_cast %58 : vector<8xf32> to vector<8x1xf32>
    %cst_24 = arith.constant 1.000000e+00 : f32
    %60 = vector.broadcast %cst_24 : f32 to vector<8x1xf32>
    %61 = arith.divf %60, %59 : vector<8x1xf32>
    %62 = vector.broadcast %61 : vector<8x1xf32> to vector<8x128xf32>
    %63 = arith.mulf %57, %62 : vector<8x128xf32>
    %c0_25 = arith.constant 0 : index
    %c256 = arith.constant 256 : index
    %64 = vector.load %arg4[%c0_25, %c256] : memref<8x512xf32, #tpu.memory_space<vmem>>, vector<8x128xf32>
    tpu.vector_store %arg4[%c0_25, %c256], %63 {strides = array<i32>} : memref<8x512xf32, #tpu.memory_space<vmem>>, vector<8x128xf32>,
    %65 = vector.extract_strided_slice %25 {offsets = [0, 384], sizes = [8, 128], strides = [1, 1]} : vector<8x512xf32> to vector<8x128xf32>
    %cst_26 = arith.constant dense<0xFF800000> : vector<8xf32>
    %66 = vector.multi_reduction <maximumf>, %65, %cst_26 [1] : vector<8x128xf32> to vector<8xf32>
    %67 = vector.shape_cast %66 : vector<8xf32> to vector<8x1xf32>
    %68 = vector.broadcast %67 : vector<8x1xf32> to vector<8x128xf32>
    %69 = arith.subf %65, %68 : vector<8x128xf32>
    %70 = math.exp %69 : vector<8x128xf32>
    %cst_27 = arith.constant dense<0.000000e+00> : vector<8xf32>
    %71 = vector.multi_reduction <add>, %70, %cst_27 [1] : vector<8x128xf32> to vector<8xf32>
    %72 = vector.shape_cast %71 : vector<8xf32> to vector<8x1xf32>
    %cst_28 = arith.constant 1.000000e+00 : f32
    %73 = vector.broadcast %cst_28 : f32 to vector<8x1xf32>
    %74 = arith.divf %73, %72 : vector<8x1xf32>
    %75 = vector.broadcast %74 : vector<8x1xf32> to vector<8x128xf32>
    %76 = arith.mulf %70, %75 : vector<8x128xf32>
    %c0_29 = arith.constant 0 : index
    %c384 = arith.constant 384 : index
    %77 = vector.load %arg4[%c0_29, %c384] : memref<8x512xf32, #tpu.memory_space<vmem>>, vector<8x128xf32>
    tpu.vector_store %arg4[%c0_29, %c384], %76 {strides = array<i32>} : memref<8x512xf32, #tpu.memory_space<vmem>>, vector<8x128xf32>,
    return
  }
  func.func @transform_0(%arg0: i32) -> (i32, i32) {
    %c0_i32 = arith.constant 0 : i32
    %c0_i32_0 = arith.constant 0 : i32
    return %arg0, %c0_i32 : i32, i32
  }
  func.func @transform_1(%arg0: i32) -> (i32, i32) {
    %c0_i32 = arith.constant 0 : i32
    %c0_i32_0 = arith.constant 0 : i32
    %c0_i32_1 = arith.constant 0 : i32
    return %c0_i32, %c0_i32_0 : i32, i32
  }
  func.func @transform_2(%arg0: i32) -> (i32, i32) {
    %c0_i32 = arith.constant 0 : i32
    %c0_i32_0 = arith.constant 0 : i32
    %c0_i32_1 = arith.constant 0 : i32
    return %c0_i32, %c0_i32_0 : i32, i32
  }
  func.func @transform_3(%arg0: i32) -> (i32, i32) {
    %c0_i32 = arith.constant 0 : i32
    %c0_i32_0 = arith.constant 0 : i32
    return %arg0, %c0_i32 : i32, i32
  }
}

</mosaic_0001>

<bundles_post_ra>
// kernel: tpu_custom_call.1
= control target key start
LH: loop header
LB: loop body
LE: loop exit
PB: predicated region body
PF: predicated region fallthrough
CT: control target
= control target key end

     0   :  { %8 = vsyncpa [#allocation3], 0  ;;  %s704_s0 = inlined_call_operand.hbm [shape: f32[8,8], index: 0, kind: input, shape index: {}]   ;;  %s705_s1 = inlined_call_operand.hbm [shape: bf16[88,128], index: 1, kind: input, shape index: {}]   ;;  %s706_s2 = inlined_call_operand.hbm [shape: bf16[72,512], index: 2, kind: input, shape index: {}]   ;;  %s707_s3 = inlined_call_operand.hbm [shape: f32[8,512], index: 3, kind: output, shape index: {}]  }
   0x1   :  { %9 = vsyncpa [#allocation6], 0  ;;  %s26_s14 = sshll.u32 %s705_s1, 4  ;;  %s27_s14 = int_to_ptr.hbm [resolvable:$true] %s26_s14 }
   0x2   :  { %10 = vsyncpa [#allocation4], 0  ;;  %s651_s15 = smov [#allocation5]   ;;  %s16_s19 = sshll.u32 %s704_s0, 4  ;;  %s17_s19 = int_to_ptr.hbm [resolvable:$true] %s16_s19 }
   0x3   :  { %s28_s16 = sshll.u32 %s651_s15, 4  ;;  %s652_s20 = smov 64   ;;  %s29_s16 = int_to_ptr.vmem [resolvable:$true] %s28_s16 }
   0x4   :  { %s653_s21 = smov 4   ;;  %s654_s22 = smov [#allocation2]  }
   0x5   :  { %34 = dma.hbm_to_vmem [thread:$0]  %s27_s14, 704, %s29_s16, [#allocation6], %s652_s20, %s652_s20, %s653_s21  }
   0x6   :  { %s18_s23 = sshll.u32 %s654_s22, 4  ;;  %s39_s26 = sshll.u32 %s706_s2, 4  ;;  %s19_s23 = int_to_ptr.vmem [resolvable:$true] %s18_s23  ;;  %s40_s26 = int_to_ptr.hbm [resolvable:$true] %s39_s26 }
   0x7   :  { %21 = dma.hbm_to_vmem [thread:$0]  %s17_s19, 128, %s19_s23, [#allocation3]  }
   0x8   :  { %s655_s1 = smov [#allocation7]   ;;  %s656_s28 = smov 256  }
   0x9   :  { %s41_s27 = sshll.u32 %s655_s1, 4  ;;  %s657_s29 = smov 16   ;;  %s42_s27 = int_to_ptr.vmem [resolvable:$true] %s41_s27 }
   0xa   :  { %47 = dma.hbm_to_vmem [thread:$0]  %s40_s26, 2304, %s42_s27, [#allocation6], %s656_s28, %s656_s28, %s657_s29  }
   0xb   :  { %645 = dma.done.wait [#allocation3], 128  }
   0xc   :  { %646 = vsyncadd [#allocation3], 4294967168 }
   0xd   :  { %647 = dma.done.wait [#allocation6], 3008  }
   0xe   :  { %648 = vsyncadd [#allocation6], 4294964288  ;;  %vm71_vm0 = vcmask 1043456   ;;  %v63_v0 = vld [vmem:[#allocation5] sm:$0xf]  ;;  %v61_v1 = vld [vmem:[#allocation2] sm:$0xff] }
   0xf   :  { %v508_v2 = vld [vmem:[#allocation5 + $0x20] sm:$0xff]  ;;  %v73_v3 = vsel %vm71_vm0, %v63_v0, 0  ;;  %v62_v4 = vpack.c.bf16 %v61_v1, %v61_v1  ;;  %vm67_vm1 = vcmask 64512   ;;  %v507_v5 = vld [vmem:[#allocation5 + $0x18] sm:$0xff]  ;;  %v506_v6 = vld [vmem:[#allocation5 + $0x10] sm:$0xff]  ;;  %vm125_vm2 = vcmask 523264  }
  0x10   :  { %82 = vmatpush.bf16.msra.mxu0 %v73_v3  ;;  %133 = vmatpush.bf16.msra.mxu1 %v508_v2  ;;  %v505_v7 = vld [vmem:[#allocation5 + $0x8] sm:$0xff]  ;;  %v523_v9 = vld [vmem:[#allocation7 + $0x6c] sm:$0xf0]  ;;  %v521_v10 = vld [vmem:[#allocation7 + $0x64] sm:$0xf]  ;;  %s658_s0 = smov [#allocation8]  }
  0x11   :  { %v487_v8 = vld [vmem:[#allocation7 + $0x60] sm:$0xf]  ;;  %v489_v12 = vld [vmem:[#allocation7 + $0x70] sm:$0xf0]  ;;  %v495_v13 = vld [vmem:[#allocation7 + $0x68] sm:$0xf] }
  0x12   :  { %v488_v11 = vor.u32 %v523_v9, %v487_v8  ;;  %v524_v14 = vld [vmem:[#allocation7 + $0x74] sm:$0xf0]  ;;  %v492_v15 = vor.u32 %v521_v10, %v489_v12  ;;  %v522_v17 = vld [vmem:[#allocation7 + $0x6c] sm:$0xf]  ;;  %v497_v18 = vld [vmem:[#allocation7 + $0x78] sm:$0xf0] }
  0x13   :  { %419 = vmatmul.msk.bf16.vlgmr.msra.gmra.mxu0 %vm67_vm1, %v62_v4  ;;  %v496_v16 = vor.u32 %v524_v14, %v495_v13  ;;  %v471_v19 = vld [vmem:[#allocation7 + $0x40] sm:$0xf]  ;;  %v500_v20 = vor.u32 %v522_v17, %v497_v18  ;;  %v519_v21 = vld [vmem:[#allocation7 + $0x4c] sm:$0xf0]  ;;  %v517_v22 = vld [vmem:[#allocation7 + $0x44] sm:$0xf] }
  0x14   :  { %134 = vmatpush.bf16.msra.mxu1 %v507_v5  ;;  %257 = vmatpush.bf16.msra.mxu2 %v488_v11  ;;  %v473_v23 = vld [vmem:[#allocation7 + $0x50] sm:$0xf0]  ;;  %v472_v24 = vor.u32 %v519_v21, %v471_v19  ;;  %v479_v26 = vld [vmem:[#allocation7 + $0x48] sm:$0xf]  ;;  %v520_v27 = vld [vmem:[#allocation7 + $0x54] sm:$0xf0] }
  0x15   :  { %270 = vmatpush.bf16.msra.mxu3 %v492_v15  ;;  %283 = vmatpush.bf16.msrb.mxu0 %v496_v16  ;;  %v476_v25 = vor.u32 %v517_v22, %v473_v23  ;;  %v518_v28 = vld [vmem:[#allocation7 + $0x4c] sm:$0xf]  ;;  %v480_v29 = vor.u32 %v520_v27, %v479_v26  ;;  %v481_v30 = vld [vmem:[#allocation7 + $0x58] sm:$0xf0]  ;;  %v64_v32 = vld [vmem:[#allocation5 + $0x4] sm:$0x1] }
  0x16   :  { %v484_v31 = vor.u32 %v518_v28, %v481_v30  ;;  %v65_v33 = vunpack.c.l.bf16 %v64_v32  ;;  %v455_v40 = vld [vmem:[#allocation7 + $0x20] sm:$0xf]  ;;  %v515_v41 = vld [vmem:[#allocation7 + $0x2c] sm:$0xf0]  ;;  %v513_v42 = vld [vmem:[#allocation7 + $0x24] sm:$0xf] }
  0x17   :  { %v456_v43 = vor.u32 %v515_v41, %v455_v40  ;;  %v457_v44 = vld [vmem:[#allocation7 + $0x30] sm:$0xf0]  ;;  %v463_v45 = vld [vmem:[#allocation7 + $0x28] sm:$0xf]  ;;  %v516_v46 = vld [vmem:[#allocation7 + $0x34] sm:$0xf0] }
  0x18   :  { %135 = vmatpush.bf16.msra.mxu1 %v506_v6  ;;  %258 = vmatpush.bf16.msra.mxu2 %v472_v24  ;;  %v66_v34 = vperm.slane %v65_v33, 0  ;;  %v460_v47 = vor.u32 %v513_v42, %v457_v44  ;;  %v464_v48 = vor.u32 %v516_v46, %v463_v45  ;;  %v514_v49 = vld [vmem:[#allocation7 + $0x2c] sm:$0xf]  ;;  %v465_v50 = vld [vmem:[#allocation7 + $0x38] sm:$0xf0]  ;;  %s406_s2 = sshll.u32 %s658_s0, 4  ;;  %s407_s2 = int_to_ptr.vmem [resolvable:$true] %s406_s2 }
  0x19   :  { %271 = vmatpush.bf16.msra.mxu3 %v476_v25  ;;  %284 = vmatpush.bf16.msrb.mxu0 %v480_v29  ;;  %v468_v51 = vor.u32 %v514_v49, %v465_v50  ;;  %v439_v52 = vld [vmem:[#allocation7] sm:$0xf]  ;;  %v511_v53 = vld [vmem:[#allocation7 + $0xc] sm:$0xf0]  ;;  %v509_v54 = vld [vmem:[#allocation7 + $0x4] sm:$0xf] }
  0x1a   :  { %v440_v55 = vor.u32 %v511_v53, %v439_v52  ;;  %v441_v56 = vld [vmem:[#allocation7 + $0x10] sm:$0xf0]  ;;  %v447_v57 = vld [vmem:[#allocation7 + $0x8] sm:$0xf]  ;;  %v512_v58 = vld [vmem:[#allocation7 + $0x14] sm:$0xf0] }
  0x1b   :  { %v444_v59 = vor.u32 %v509_v54, %v441_v56  ;;  %v448_v60 = vor.u32 %v512_v58, %v447_v57  ;;  %v510_v61 = vld [vmem:[#allocation7 + $0xc] sm:$0xf]  ;;  %v449_v62 = vld [vmem:[#allocation7 + $0x18] sm:$0xf0]  ;;  %v159_v10 = vld [vmem:[#allocation7 + $0x80] sm:$0x11] }
  0x1c   :  { %136 = vmatpush.bf16.msra.mxu1 %v505_v7  ;;  %259 = vmatpush.bf16.msra.mxu2 %v456_v43  ;;  %v452_v63 = vor.u32 %v510_v61, %v449_v62  ;;  %v97_v0 = vld [vmem:[#allocation5 + $0x28] sm:$0x1]  ;;  %v160_v8 = vld [vmem:[#allocation7 + $0x88] sm:$0x11]  ;;  %v161_v12 = vunpack.c.l.bf16 %v159_v10  ;;  %v162_v22 = vunpack.c.h.bf16 %v159_v10  ;;  %s408_s5 = sshll.u32 %s707_s3, 4  ;;  %s409_s5 = int_to_ptr.hbm [resolvable:$true] %s408_s5 }
  0x1d   :  { %272 = vmatpush.bf16.msra.mxu3 %v460_v47  ;;  %285 = vmatpush.bf16.msrb.mxu0 %v464_v48  ;;  %v98_v1 = vunpack.c.l.bf16 %v97_v0  ;;  %v163_v9 = vunpack.c.l.bf16 %v160_v8  ;;  %v164_v16 = vunpack.c.h.bf16 %v160_v8 }
  0x1e   :  { %v166_v17 = vperm.slane %v161_v12, 0  ;;  %v167_v26 = vperm.slane %v162_v22, 0 }
  0x1f   :  { %v100_v2 = vperm.slane %v98_v1, 0  ;;  %v168_v11 = vperm.slane %v163_v9, 0  ;;  %v169_v18 = vperm.slane %v164_v16, 0 }
  0x20   :  { %296 = vmatpush.bf16.msrb.mxu1 %v500_v20  ;;  %260 = vmatpush.bf16.msra.mxu2 %v440_v55 }
  0x21   :  { %273 = vmatpush.bf16.msra.mxu3 %v444_v59  ;;  %286 = vmatpush.bf16.msrb.mxu0 %v448_v60 }
  0x24   :  { %297 = vmatpush.bf16.msrb.mxu1 %v484_v31 }
  0x28   :  { %298 = vmatpush.bf16.msrb.mxu1 %v468_v51 }
  0x2c   :  { %299 = vmatpush.bf16.msrb.mxu1 %v452_v63 }
  0x90   :  { %v84_v35 = vpop.f32.mrf.mxu0 }
  0x91   :  { %v85_v36 = vadd.f32 %v84_v35, %v66_v34 }
  0x93   :  { %v88_v37 = vmax.f32 %v85_v36, 0.0 }
  0x95   :  { %v99_v38 = vpack.c.bf16 %v88_v37, %v88_v37 }
  0x97   :  { %436 = vmatmul.msk.bf16.vlgmr.msra.gmra.mxu1 %vm125_vm2, %v99_v38 }
  0x98   :  { %v86_v39 = vpop.f32.mrf.mxu0 }
 0x114   :  { %v138_v3 = vpop.f32.mrf.mxu1 }
 0x115   :  { %v139_v4 = vadd.f32 %v138_v3, %v100_v2 }
 0x117   :  { %v142_v5 = vmax.f32 %v139_v4, 0.0 }
 0x119   :  { %v165_v6 = vpack.c.bf16 %v142_v5, %v142_v5 }
 0x11b   :  { %501 = vmatmul.msk.bf16.vlgmr.msra.gmra.mxu2 %vm125_vm2, %v165_v6  ;;  %502 = vmatmul.msk.bf16.vlgmr.msra.gmra.mxu3 %vm125_vm2, %v165_v6 }
 0x11c   :  { %503 = vmatmul.msk.bf16.vlgmr.msrb.gmra.mxu0 %vm125_vm2, %v165_v6  ;;  %504 = vmatmul.msk.bf16.vlgmr.msrb.gmra.mxu1 %vm125_vm2, %v165_v6  ;;  %v140_v7 = vpop.f32.mrf.mxu1 }
 0x199   :  { %v288_v13 = vpop.f32.mrf.mxu0  ;;  %v301_v14 = vpop.f32.mrf.mxu1 }
 0x19a   :  { %v289_v15 = vadd.f32 %v288_v13, %v168_v11  ;;  %v302_v25 = vadd.f32 %v301_v14, %v169_v18 }
 0x19c   :  { %353 = vmax.xlane.f32.xlu1 %v289_v15 }
 0x19e   :  { %v262_v19 = vpop.f32.mrf.mxu2  ;;  %v275_v20 = vpop.f32.mrf.mxu3 }
 0x19f   :  { %v263_v21 = vadd.f32 %v262_v19, %v166_v17  ;;  %v276_v29 = vadd.f32 %v275_v20, %v167_v26 }
 0x1a1   :  { %v290_v23 = vpop.f32.mrf.mxu0  ;;  %v303_v24 = vpop.f32.mrf.mxu1  ;;  %305 = vmax.xlane.f32.xlu0 %v263_v21 }
 0x1a4   :  { %377 = vmax.xlane.f32.xlu1 %v302_v25 }
 0x1a6   :  { %v264_v27 = vpop.f32.mrf.mxu2  ;;  %v277_v28 = vpop.f32.mrf.mxu3 }
 0x1a9   :  { %329 = vmax.xlane.f32.xlu0 %v276_v29 }
 0x20f   :  { %v354_v30 = vpop.xlane.xlu1 %353 }
 0x210   :  { %v355_v31 = vsub.f32 %v289_v15, %v354_v30 }
 0x212   :  { %v356_v32 = vmul.f32 1.442695, %v355_v31 }
 0x214   :  { %533 = vpow2.f32 %v356_v32  ;;  %v306_v33 = vpop.xlane.xlu0 %305 }
 0x215   :  { %v307_v34 = vsub.f32 %v263_v21, %v306_v33 }
 0x217   :  { %v308_v35 = vmul.f32 1.442695, %v307_v34  ;;  %v378_v36 = vpop.xlane.xlu1 %377 }
 0x218   :  { %v379_v37 = vsub.f32 %v302_v25, %v378_v36 }
 0x219   :  { %535 = vpow2.f32 %v308_v35 }
 0x21a   :  { %v534_v38 = vpop.eup %533  ;;  %v380_v39 = vmul.f32 1.442695, %v379_v37 }
 0x21b   :  { %358 = vadd.xlane.f32.xlu0 %v534_v38 }
 0x21c   :  { %537 = vpow2.f32 %v380_v39  ;;  %v330_v40 = vpop.xlane.xlu0 %329 }
 0x21d   :  { %v331_v41 = vsub.f32 %v276_v29, %v330_v40 }
 0x21f   :  { %v536_v42 = vpop.eup %535  ;;  %v332_v43 = vmul.f32 1.442695, %v331_v41 }
 0x220   :  { %310 = vadd.xlane.f32.xlu2 %v536_v42 }
 0x221   :  { %539 = vpow2.f32 %v332_v43 }
 0x222   :  { %v693_v44 = vpop.eup %537 }
 0x223   :  { %382 = vadd.xlane.f32.xlu1 %v693_v44 }
 0x227   :  { %v696_v45 = vpop.eup %539 }
 0x228   :  { %334 = vadd.xlane.f32.xlu2 %v696_v45 }
 0x28e   :  { %v359_v46 = vpop.xlane.xlu0 %358 }
 0x28f   :  { %541 = vrcp.f32 %v359_v46  ;;  %v371_v52 = vand.u32 2147483648, %v359_v46  ;;  %v369_v55 = vand.u32 2147483647, %v359_v46  ;;  %vm365_vm4 = vweird.f32 %v359_v46 }
 0x291   :  { %v372_v60 = vor.u32 1.1754944e-38, %v371_v52  ;;  %vm370_vm6 = vcmp.eq.f32.partialorder %v369_v55, 8.507059e+37 }
 0x293   :  { %v311_v47 = vpop.xlane.xlu2 %310 }
 0x294   :  { %543 = vrcp.f32 %v311_v47  ;;  %v323_v63 = vand.u32 2147483648, %v311_v47  ;;  %v321_v3 = vand.u32 2147483647, %v311_v47  ;;  %vm317_vm8 = vweird.f32 %v311_v47 }
 0x295   :  { %v542_v48 = vpop.eup %541 }
 0x296   :  { %v361_v49 = vmul.f32 %v542_v48, %v359_v46  ;;  %v383_v50 = vpop.xlane.xlu1 %382  ;;  %vm366_vm3 = vweird.f32 %v542_v48  ;;  %v324_v9 = vor.u32 1.1754944e-38, %v323_v63  ;;  %vm322_vm11 = vcmp.eq.f32.partialorder %v321_v3, 8.507059e+37 }
 0x297   :  { %545 = vrcp.f32 %v383_v50  ;;  %vm367_vm5 = vmor %vm365_vm4, %vm366_vm3  ;;  %v395_v7 = vand.u32 2147483648, %v383_v50  ;;  %v393_v11 = vand.u32 2147483647, %v383_v50  ;;  %vm389_vm12 = vweird.f32 %v383_v50 }
 0x298   :  { %v362_v51 = vsub.f32 1.0, %v361_v49 }
 0x299   :  { %v396_v17 = vor.u32 1.1754944e-38, %v395_v7  ;;  %vm394_vm14 = vcmp.eq.f32.partialorder %v393_v11, 8.507059e+37 }
 0x29a   :  { %v544_v53 = vpop.eup %543  ;;  %v363_v54 = vmul.f32 %v542_v48, %v362_v51 }
 0x29b   :  { %v313_v56 = vmul.f32 %v544_v53, %v311_v47  ;;  %v335_v57 = vpop.xlane.xlu2 %334  ;;  %vm318_vm7 = vweird.f32 %v544_v53 }
 0x29c   :  { %v364_v58 = vadd.f32 %v542_v48, %v363_v54  ;;  %547 = vrcp.f32 %v335_v57  ;;  %vm319_vm9 = vmor %vm317_vm8, %vm318_vm7  ;;  %v347_v20 = vand.u32 2147483648, %v335_v57  ;;  %v345_v23 = vand.u32 2147483647, %v335_v57 }
 0x29d   :  { %v546_v59 = vpop.eup %545  ;;  %v314_v61 = vsub.f32 1.0, %v313_v56  ;;  %vm341_vm0 = vweird.f32 %v335_v57 }
 0x29e   :  { %v368_v62 = vsel %vm367_vm5, %v542_v48, %v364_v58  ;;  %v385_v0 = vmul.f32 %v546_v59, %v383_v50  ;;  %vm390_vm10 = vweird.f32 %v546_v59  ;;  %v348_v26 = vor.u32 1.1754944e-38, %v347_v20 }
 0x29f   :  { %v373_v1 = vsel %vm370_vm6, %v372_v60, %v368_v62  ;;  %v315_v2 = vmul.f32 %v544_v53, %v314_v61  ;;  %vm391_vm13 = vmor %vm389_vm12, %vm390_vm10  ;;  %vm346_vm2 = vcmp.eq.f32.partialorder %v345_v23, 8.507059e+37 }
 0x2a0   :  { %v375_v4 = vmul.f32 %v534_v38, %v373_v1  ;;  %v386_v5 = vsub.f32 1.0, %v385_v0 }
 0x2a1   :  { %v316_v6 = vadd.f32 %v544_v53, %v315_v2 }
 0x2a2   :  { %v548_v8 = vpop.eup %547  ;;  %376 = vst [vmem:[#allocation8 + $0x10] sm:$0xff] %v375_v4  ;;  %v387_v10 = vmul.f32 %v546_v59, %v386_v5 }
 0x2a3   :  { %v320_v12 = vsel %vm319_vm9, %v544_v53, %v316_v6  ;;  %v337_v13 = vmul.f32 %v548_v8, %v335_v57  ;;  %vm342_vm15 = vweird.f32 %v548_v8 }
 0x2a4   :  { %v325_v14 = vsel %vm322_vm11, %v324_v9, %v320_v12  ;;  %v388_v15 = vadd.f32 %v546_v59, %v387_v10  ;;  %vm343_vm1 = vmor %vm341_vm0, %vm342_vm15 }
 0x2a5   :  { %v327_v16 = vmul.f32 %v536_v42, %v325_v14  ;;  %v338_v18 = vsub.f32 1.0, %v337_v13 }
 0x2a6   :  { %v392_v19 = vsel %vm391_vm13, %v546_v59, %v388_v15 }
 0x2a7   :  { %328 = vst [vmem:[#allocation8] sm:$0xff] %v327_v16  ;;  %v397_v21 = vsel %vm394_vm14, %v396_v17, %v392_v19  ;;  %v339_v22 = vmul.f32 %v548_v8, %v338_v18 }
 0x2a8   :  { %v399_v24 = vmul.f32 %v693_v44, %v397_v21 }
 0x2a9   :  { %v340_v25 = vadd.f32 %v548_v8, %v339_v22 }
 0x2aa   :  { %400 = vst [vmem:[#allocation8 + $0x18] sm:$0xff] %v399_v24 }
 0x2ab   :  { %v344_v27 = vsel %vm343_vm1, %v548_v8, %v340_v25 }
 0x2ac   :  { %v349_v28 = vsel %vm346_vm2, %v348_v26, %v344_v27 }
 0x2ad   :  { %v351_v29 = vmul.f32 %v696_v45, %v349_v28 }
 0x2af   :  { %352 = vst [vmem:[#allocation8 + $0x8] sm:$0xff] %v351_v29 }
 0x2b0   :  { %411 = dma.vmem_to_hbm [thread:$0]  %s407_s2, 512, %s409_s5, [#allocation4]  }
 0x2b1   :  { %649 = dma.done.wait [#allocation4], 512  }
 0x2b2   :  { %650 = vsyncadd [#allocation4], 4294966784 }
 0x2b3   :  { %416 = vsyncpa [#allocation3], 1 }
 0x2b4   :  { %417 = vsyncpa [#allocation6], 1 }
 0x2b5   :  { %418 = vsyncpa [#allocation4], 1 }

</bundles_post_ra>
